<compile_context>
chip_gen: v6e
topology: v6e:2x2x1
jax: 0.10.0
libtpu: 0.0.40
codegen_flags: <defaults>
</compile_context>

<pallas_src>
import functools

import jax
import jax.numpy as jnp
from jax import lax
from jax.experimental import pallas as pl
from jax.experimental.pallas import tpu as pltpu

_BN_EPS = 1e-5


def _make_fused_kernel(t, seg_sizes, d_outs, row_offs, matmul_dtype):
    """Build the fused NN_dense forward kernel.

    seg_sizes: per-layer tuple of segment widths (layer i consumes
               [input_size] + [hidden_size]*i feature segments).
    d_outs:    per-layer output width.
    row_offs:  starting row of each layer's block inside the packed weight slab.
    """
    n_layers = len(d_outs)
    inv_t = 1.0 / float(t)

    def normalize(xs):
        # Two-pass, cancellation-safe batch stats (BatchNorm1d training semantics:
        # biased variance, eps inside the rsqrt).  Sublane reductions -> XLU slot,
        # keeping the MXU free for the layer matmuls.
        mean = jnp.sum(xs, axis=0, keepdims=True) * inv_t
        centered = xs - mean
        var = jnp.sum(centered * centered, axis=0, keepdims=True) * inv_t
        inv_std = lax.rsqrt(var + _BN_EPS)
        return (centered * inv_std).astype(matmul_dtype)

    def kernel(x_ref, w_ref, b_ref, o_ref):
        # Normalised feature segments (original x, then each layer's output).
        # torch.cat((x, out), dim=1) is realised implicitly by keeping this list and
        # splitting each layer's matmul over the segments; stats/cast happen once per
        # segment because BN batch statistics do not depend on the consuming layer.
        seg_hat = [normalize(x_ref[...].astype(jnp.float32))]

        for i in range(n_layers):
            d_out = d_outs[i]
            row = row_offs[i]
            # Back-to-back MXU dots, all prep hoisted out of the dot chain
            # (v7x MRB-accumulation friendly; one dot per (layer, segment)).
            acc = None
            for s, seg in enumerate(seg_sizes[i]):
                part = jnp.dot(seg_hat[s], w_ref[row:row + seg, 0:d_out],
                               preferred_element_type=jnp.float32)
                acc = part if acc is None else acc + part
                row += seg
            out = acc + b_ref[i:i + 1, 0:d_out]          # folded (beta @ W + b), f32

            if i + 1 < n_layers:
                seg_hat.append(normalize(out))            # new feature segment
            else:
                o_ref[...] = out.astype(o_ref.dtype)

    return kernel


def pack_params(params, input_size, hidden_size, matmul_dtype=jnp.bfloat16):
    """Fold BN affine params into the linear layers and pack into two slabs.

    Exact identity used:  bn(x) @ W + b = xhat @ (gamma[:,None] * W) + (beta @ W + b)
    with xhat = (x - mean) * rsqrt(var + eps), so gamma/beta never enter the kernel.

    Returns (w_slab, bias_slab, meta):
      w_slab    [sum_i d_in_i, max_d_out]  matmul_dtype  (layer blocks stacked on rows)
      bias_slab [n_layers, max_d_out]      f32           (zero padded per row)
      meta      static layout info for the kernel builder.
    """
    max_d_out = max(int(p["w_t"].shape[1]) for p in params)

    seg_sizes, d_outs, row_offs = [], [], []
    w_blocks, bias_rows = [], []
    row = 0
    for i, p in enumerate(params):
        d_in, d_out = int(p["w_t"].shape[0]), int(p["w_t"].shape[1])
        sizes = tuple([input_size] + [hidden_size] * i)
        assert sum(sizes) == d_in
        seg_sizes.append(sizes)
        d_outs.append(d_out)
        row_offs.append(row)
        row += d_in

        w_f32 = p["w_t"].astype(jnp.float32)
        w_eff = (p["gamma"].astype(jnp.float32)[:, None] * w_f32).astype(matmul_dtype)
        b_eff = p["beta"].astype(jnp.float32) @ w_f32 + p["b"].astype(jnp.float32)

        w_blocks.append(jnp.pad(w_eff, ((0, 0), (0, max_d_out - d_out))))
        bias_rows.append(jnp.pad(b_eff, (0, max_d_out - d_out)))

    w_slab = jnp.concatenate(w_blocks, axis=0)
    bias_slab = jnp.stack(bias_rows, axis=0).astype(jnp.float32)
    meta = dict(seg_sizes=tuple(seg_sizes), d_outs=tuple(d_outs),
                row_offs=tuple(row_offs))
    return w_slab, bias_slab, meta


def nn_dense_forward(x, w_slab, bias_slab, *, seg_sizes, d_outs, row_offs,
                     matmul_dtype=jnp.bfloat16):
    """Fused forward of NN_dense: one gridless pallas_call for the whole stack."""
    x = x.astype(jnp.float32)
    t, _ = x.shape
    output_size = d_outs[-1]
    n_layers = len(d_outs)

    kernel = _make_fused_kernel(t, seg_sizes, d_outs, row_offs, matmul_dtype)

    # Advisory cost estimate so XLA schedules the fused call sensibly.
    flops = sum(2 * t * sum(seg_sizes[i]) * d_outs[i] for i in range(n_layers))
    n_feat = sum(seg_sizes[-1])                  # distinct features that get stats
    flops += 5 * t * n_feat                      # two-pass stats + normalisation
    bytes_accessed = int(x.size * 4
                         + w_slab.size * jnp.dtype(w_slab.dtype).itemsize
                         + bias_slab.size * 4
                         + t * output_size * 4)
    cost = pl.CostEstimate(flops=int(flops), transcendentals=int(n_feat),
                           bytes_accessed=bytes_accessed)

    return pl.pallas_call(
        kernel,
        out_shape=jax.ShapeDtypeStruct((t, output_size), jnp.float32),
        in_specs=[pl.BlockSpec(x.shape, lambda: (0, 0)),
                  pl.BlockSpec(w_slab.shape, lambda: (0, 0)),
                  pl.BlockSpec(bias_slab.shape, lambda: (0, 0))],
        out_specs=pl.BlockSpec((t, output_size), lambda: (0, 0)),
        cost_estimate=cost,
        # Tiny working set; explicit limit stays far below v7x's 64 MiB physical VMEM
        # per TensorCore (128 MiB on v5e/v6e).
        compiler_params=pltpu.CompilerParams(vmem_limit_bytes=32 * 1024 * 1024),
    )(x, w_slab, bias_slab)


def init_params(key, input_size, hidden_size, output_size, num_hLayer):
    """Deterministic parameter init mirroring NN_dense.__init__ shapes.

    Linear: U(-1/sqrt(fan_in), 1/sqrt(fan_in)) like the PyTorch default.
    BatchNorm1d: gamma = 1, beta = 0 (PyTorch default).
    """
    in_dims = [input_size + hidden_size * i for i in range(num_hLayer)]
    in_dims.append(input_size + hidden_size * num_hLayer)
    out_dims = [hidden_size] * num_hLayer + [output_size]

    params = []
    for d_in, d_out in zip(in_dims, out_dims):
        key, kw, kb = jax.random.split(key, 3)
        bound = 1.0 / jnp.sqrt(jnp.float32(d_in))
        w = jax.random.uniform(kw, (d_out, d_in), jnp.float32, -bound, bound)
        b = jax.random.uniform(kb, (d_out,), jnp.float32, -bound, bound)
        gamma = jnp.ones((d_in,), jnp.float32)
        beta = jnp.zeros((d_in,), jnp.float32)
        params.append(dict(gamma=gamma, beta=beta, w_t=w.T, b=b))
    return params


def nn_dense_reference(x, params, num_hLayer):
    """Pure-JAX (f32) reference for correctness checking (matches the torch module)."""
    def bn_lin(x, p):
        mean = jnp.mean(x, axis=0, keepdims=True)
        var = jnp.mean((x - mean) ** 2, axis=0, keepdims=True)
        y = (x - mean) * lax.rsqrt(var + _BN_EPS) * p["gamma"] + p["beta"]
        return y @ p["w_t"] + p["b"]

    for i in range(num_hLayer):
        out = bn_lin(x, params[i])
        x = jnp.concatenate([x, out], axis=1)
    return bn_lin(x, params[num_hLayer])


if __name__ == "__main__":
    # Small shapes consistent with the module: x is [t, input_size].
    t = 16
    input_size = 32
    hidden_size = 32
    output_size = 16
    num_hLayer = 2

    key = jax.random.PRNGKey(0)
    key, kx = jax.random.split(key)
    x = jax.random.normal(kx, (t, input_size), jnp.float32)
    params = init_params(key, input_size, hidden_size, output_size, num_hLayer)

    ref = nn_dense_reference(x, params, num_hLayer)

    # Validation path: f32 MXU operands (tight match against the f32 PyTorch module).
    w32, b32, meta = pack_params(params, input_size, hidden_size, jnp.float32)
    fwd_f32 = jax.jit(functools.partial(nn_dense_forward,
                                        matmul_dtype=jnp.float32, **meta))
    out_f32 = jax.block_until_ready(fwd_f32(x, w32, b32))
    assert out_f32.shape == (t, output_size)
    assert jnp.allclose(out_f32, ref, atol=1e-3, rtol=1e-3)

    # Performance path (default / production): bf16 MXU operands, f32 accumulation.
    wbf, bbf, meta = pack_params(params, input_size, hidden_size, jnp.bfloat16)
    fwd_bf16 = jax.jit(functools.partial(nn_dense_forward,
                                         matmul_dtype=jnp.bfloat16, **meta))
    out_bf16 = jax.block_until_ready(fwd_bf16(x, wbf, bbf))
    assert out_bf16.shape == (t, output_size)
    assert jnp.allclose(out_bf16, ref, atol=5e-2, rtol=5e-2)

    print("KERNEL_OK")
</pallas_src>

<mosaic_0001>
module attributes {stable_mosaic.version = 11 : i64} {
  func.func @kernel(%arg0: memref<16x32xf32, #tpu.memory_space<vmem>>, %arg1: memref<192x32xf32, #tpu.memory_space<vmem>>, %arg2: memref<3x32xf32, #tpu.memory_space<vmem>>, %arg3: memref<16x16xf32, #tpu.memory_space<vmem>>) attributes {dimension_semantics = [], scalar_prefetch = 0 : i64, scratch_operands = 0 : i64, tpu.core_type = #tpu.core_type<tc>} {
    %c0 = arith.constant 0 : index
    %c0_0 = arith.constant 0 : index
    %0 = vector.load %arg0[%c0, %c0_0] : memref<16x32xf32, #tpu.memory_space<vmem>>, vector<16x32xf32>
    %cst = arith.constant dense<0.000000e+00> : vector<32xf32>
    %1 = vector.multi_reduction <add>, %0, %cst [0] : vector<16x32xf32> to vector<32xf32>
    %2 = vector.shape_cast %1 : vector<32xf32> to vector<1x32xf32>
    %cst_1 = arith.constant 6.250000e-02 : f32
    %3 = vector.broadcast %cst_1 : f32 to vector<1x32xf32>
    %4 = arith.mulf %2, %3 : vector<1x32xf32>
    %5 = vector.broadcast %4 : vector<1x32xf32> to vector<16x32xf32>
    %6 = arith.subf %0, %5 : vector<16x32xf32>
    %7 = arith.mulf %6, %6 : vector<16x32xf32>
    %cst_2 = arith.constant dense<0.000000e+00> : vector<32xf32>
    %8 = vector.multi_reduction <add>, %7, %cst_2 [0] : vector<16x32xf32> to vector<32xf32>
    %9 = vector.shape_cast %8 : vector<32xf32> to vector<1x32xf32>
    %cst_3 = arith.constant 6.250000e-02 : f32
    %10 = vector.broadcast %cst_3 : f32 to vector<1x32xf32>
    %11 = arith.mulf %9, %10 : vector<1x32xf32>
    %cst_4 = arith.constant 9.99999974E-6 : f32
    %12 = vector.broadcast %cst_4 : f32 to vector<1x32xf32>
    %13 = arith.addf %11, %12 : vector<1x32xf32>
    %14 = math.rsqrt %13 : vector<1x32xf32>
    %15 = vector.broadcast %14 : vector<1x32xf32> to vector<16x32xf32>
    %16 = arith.mulf %6, %15 : vector<16x32xf32>
    %c0_5 = arith.constant 0 : index
    %c0_6 = arith.constant 0 : index
    %17 = vector.load %arg1[%c0_5, %c0_6] : memref<192x32xf32, #tpu.memory_space<vmem>>, vector<32x32xf32>
    %cst_7 = arith.constant dense<0.000000e+00> : vector<16x32xf32>
    %18 = tpu.matmul %16, %17, %cst_7 {dimension_numbers = #tpu.dot_dimension_numbers<[1], [0], [0], [1], [0, 0, 1, 1], [], []>} : vector<16x32xf32>, vector<32x32xf32>, vector<16x32xf32> -> vector<16x32xf32>
    %c0_8 = arith.constant 0 : index
    %c0_9 = arith.constant 0 : index
    %19 = vector.load %arg2[%c0_8, %c0_9] : memref<3x32xf32, #tpu.memory_space<vmem>>, vector<1x32xf32>
    %20 = vector.broadcast %19 : vector<1x32xf32> to vector<16x32xf32>
    %21 = arith.addf %18, %20 : vector<16x32xf32>
    %cst_10 = arith.constant dense<0.000000e+00> : vector<32xf32>
    %22 = vector.multi_reduction <add>, %21, %cst_10 [0] : vector<16x32xf32> to vector<32xf32>
    %23 = vector.shape_cast %22 : vector<32xf32> to vector<1x32xf32>
    %cst_11 = arith.constant 6.250000e-02 : f32
    %24 = vector.broadcast %cst_11 : f32 to vector<1x32xf32>
    %25 = arith.mulf %23, %24 : vector<1x32xf32>
    %26 = vector.broadcast %25 : vector<1x32xf32> to vector<16x32xf32>
    %27 = arith.subf %21, %26 : vector<16x32xf32>
    %28 = arith.mulf %27, %27 : vector<16x32xf32>
    %cst_12 = arith.constant dense<0.000000e+00> : vector<32xf32>
    %29 = vector.multi_reduction <add>, %28, %cst_12 [0] : vector<16x32xf32> to vector<32xf32>
    %30 = vector.shape_cast %29 : vector<32xf32> to vector<1x32xf32>
    %cst_13 = arith.constant 6.250000e-02 : f32
    %31 = vector.broadcast %cst_13 : f32 to vector<1x32xf32>
    %32 = arith.mulf %30, %31 : vector<1x32xf32>
    %cst_14 = arith.constant 9.99999974E-6 : f32
    %33 = vector.broadcast %cst_14 : f32 to vector<1x32xf32>
    %34 = arith.addf %32, %33 : vector<1x32xf32>
    %35 = math.rsqrt %34 : vector<1x32xf32>
    %36 = vector.broadcast %35 : vector<1x32xf32> to vector<16x32xf32>
    %37 = arith.mulf %27, %36 : vector<16x32xf32>
    %c32 = arith.constant 32 : index
    %c0_15 = arith.constant 0 : index
    %38 = vector.load %arg1[%c32, %c0_15] : memref<192x32xf32, #tpu.memory_space<vmem>>, vector<32x32xf32>
    %cst_16 = arith.constant dense<0.000000e+00> : vector<16x32xf32>
    %39 = tpu.matmul %16, %38, %cst_16 {dimension_numbers = #tpu.dot_dimension_numbers<[1], [0], [0], [1], [0, 0, 1, 1], [], []>} : vector<16x32xf32>, vector<32x32xf32>, vector<16x32xf32> -> vector<16x32xf32>
    %c64 = arith.constant 64 : index
    %c0_17 = arith.constant 0 : index
    %40 = vector.load %arg1[%c64, %c0_17] : memref<192x32xf32, #tpu.memory_space<vmem>>, vector<32x32xf32>
    %cst_18 = arith.constant dense<0.000000e+00> : vector<16x32xf32>
    %41 = tpu.matmul %37, %40, %cst_18 {dimension_numbers = #tpu.dot_dimension_numbers<[1], [0], [0], [1], [0, 0, 1, 1], [], []>} : vector<16x32xf32>, vector<32x32xf32>, vector<16x32xf32> -> vector<16x32xf32>
    %42 = arith.addf %39, %41 : vector<16x32xf32>
    %c1 = arith.constant 1 : index
    %c0_19 = arith.constant 0 : index
    %43 = vector.load %arg2[%c1, %c0_19] : memref<3x32xf32, #tpu.memory_space<vmem>>, vector<1x32xf32>
    %44 = vector.broadcast %43 : vector<1x32xf32> to vector<16x32xf32>
    %45 = arith.addf %42, %44 : vector<16x32xf32>
    %cst_20 = arith.constant dense<0.000000e+00> : vector<32xf32>
    %46 = vector.multi_reduction <add>, %45, %cst_20 [0] : vector<16x32xf32> to vector<32xf32>
    %47 = vector.shape_cast %46 : vector<32xf32> to vector<1x32xf32>
    %cst_21 = arith.constant 6.250000e-02 : f32
    %48 = vector.broadcast %cst_21 : f32 to vector<1x32xf32>
    %49 = arith.mulf %47, %48 : vector<1x32xf32>
    %50 = vector.broadcast %49 : vector<1x32xf32> to vector<16x32xf32>
    %51 = arith.subf %45, %50 : vector<16x32xf32>
    %52 = arith.mulf %51, %51 : vector<16x32xf32>
    %cst_22 = arith.constant dense<0.000000e+00> : vector<32xf32>
    %53 = vector.multi_reduction <add>, %52, %cst_22 [0] : vector<16x32xf32> to vector<32xf32>
    %54 = vector.shape_cast %53 : vector<32xf32> to vector<1x32xf32>
    %cst_23 = arith.constant 6.250000e-02 : f32
    %55 = vector.broadcast %cst_23 : f32 to vector<1x32xf32>
    %56 = arith.mulf %54, %55 : vector<1x32xf32>
    %cst_24 = arith.constant 9.99999974E-6 : f32
    %57 = vector.broadcast %cst_24 : f32 to vector<1x32xf32>
    %58 = arith.addf %56, %57 : vector<1x32xf32>
    %59 = math.rsqrt %58 : vector<1x32xf32>
    %60 = vector.broadcast %59 : vector<1x32xf32> to vector<16x32xf32>
    %61 = arith.mulf %51, %60 : vector<16x32xf32>
    %c96 = arith.constant 96 : index
    %c0_25 = arith.constant 0 : index
    %62 = vector.load %arg1[%c96, %c0_25] : memref<192x32xf32, #tpu.memory_space<vmem>>, vector<32x16xf32>
    %cst_26 = arith.constant dense<0.000000e+00> : vector<16x16xf32>
    %63 = tpu.matmul %16, %62, %cst_26 {dimension_numbers = #tpu.dot_dimension_numbers<[1], [0], [0], [1], [0, 0, 1, 1], [], []>} : vector<16x32xf32>, vector<32x16xf32>, vector<16x16xf32> -> vector<16x16xf32>
    %c128 = arith.constant 128 : index
    %c0_27 = arith.constant 0 : index
    %64 = vector.load %arg1[%c128, %c0_27] : memref<192x32xf32, #tpu.memory_space<vmem>>, vector<32x16xf32>
    %cst_28 = arith.constant dense<0.000000e+00> : vector<16x16xf32>
    %65 = tpu.matmul %37, %64, %cst_28 {dimension_numbers = #tpu.dot_dimension_numbers<[1], [0], [0], [1], [0, 0, 1, 1], [], []>} : vector<16x32xf32>, vector<32x16xf32>, vector<16x16xf32> -> vector<16x16xf32>
    %66 = arith.addf %63, %65 : vector<16x16xf32>
    %c160 = arith.constant 160 : index
    %c0_29 = arith.constant 0 : index
    %67 = vector.load %arg1[%c160, %c0_29] : memref<192x32xf32, #tpu.memory_space<vmem>>, vector<32x16xf32>
    %cst_30 = arith.constant dense<0.000000e+00> : vector<16x16xf32>
    %68 = tpu.matmul %61, %67, %cst_30 {dimension_numbers = #tpu.dot_dimension_numbers<[1], [0], [0], [1], [0, 0, 1, 1], [], []>} : vector<16x32xf32>, vector<32x16xf32>, vector<16x16xf32> -> vector<16x16xf32>
    %69 = arith.addf %66, %68 : vector<16x16xf32>
    %c2 = arith.constant 2 : index
    %c0_31 = arith.constant 0 : index
    %70 = vector.load %arg2[%c2, %c0_31] : memref<3x32xf32, #tpu.memory_space<vmem>>, vector<1x16xf32>
    %71 = vector.broadcast %70 : vector<1x16xf32> to vector<16x16xf32>
    %72 = arith.addf %69, %71 : vector<16x16xf32>
    %c0_32 = arith.constant 0 : index
    %c0_33 = arith.constant 0 : index
    %73 = vector.load %arg3[%c0_32, %c0_33] : memref<16x16xf32, #tpu.memory_space<vmem>>, vector<16x16xf32>
    tpu.vector_store %arg3[%c0_32, %c0_33], %72 {strides = array<i32>} : memref<16x16xf32, #tpu.memory_space<vmem>>, vector<16x16xf32>,
    return
  }
}

</mosaic_0001>

<bundles_post_ra>
// kernel: nn_dense_forward.1
= control target key start
LH: loop header
LB: loop body
LE: loop exit
PB: predicated region body
PF: predicated region fallthrough
CT: control target
= control target key end

     0   :  { %vm17_vm0 = vcmask 261120   ;;  %s919_s0 = inlined_call_operand.vmem [shape: f32[16,32], index: 0, kind: input, shape index: {}]   ;;  %s920_s1 = inlined_call_operand.vmem [shape: f32[192,32], index: 1, kind: input, shape index: {}]   ;;  %s921_s2 = inlined_call_operand.vmem [shape: f32[3,32], index: 2, kind: input, shape index: {}]   ;;  %s922_s3 = inlined_call_operand.hbm [shape: f32[16,16], index: 3, kind: output, shape index: {}]  }
   0x1   :  { %v49_v0 = vld [vmem:[%s920_s1 + $0x18] sm:$0xff]  ;;  %v48_v1 = vld [vmem:[%s920_s1 + $0x10] sm:$0xff]  ;;  %v15_v2 = vld [vmem:[%s919_s0] sm:$0xff] }
   0x2   :  { %685 = vmatprep.subr.mxu0 %v49_v0  ;;  %v16_v3 = vld [vmem:[%s919_s0 + $0x8] sm:$0xff]  ;;  %v18_v5 = vsel %vm17_vm0, %v15_v2, 0.0 }
   0x3   :  { %686 = vmatpush3.msra.mxu0 %v49_v0  ;;  %v47_v4 = vld [vmem:[%s920_s1 + $0x8] sm:$0xff]  ;;  %v19_v6 = vsel %vm17_vm0, %v16_v3, 0.0 }
   0x4   :  { %8 = vsyncpa [#allocation3], 0  ;;  %687 = vmatprep.subr.mxu0 %v48_v1  ;;  %v20_v7 = vadd.f32 %v19_v6, %v18_v5  ;;  %v46_v8 = vld [vmem:[%s920_s1] sm:$0xff]  ;;  %v167_v34 = vld [vmem:[%s920_s1 + $0x38] sm:$0xff]  ;;  %vm615_vm1 = vcmask 130048   ;;  %s782_s13 = smov [#allocation2]  }
   0x5   :  { %688 = vmatpush3.msra.mxu0 %v48_v1  ;;  %v171_v35 = vld [vmem:[%s920_s1 + $0x58] sm:$0xff]  ;;  %v166_v36 = vld [vmem:[%s920_s1 + $0x30] sm:$0xff]  ;;  %v165_v38 = vld [vmem:[%s920_s1 + $0x28] sm:$0xff]  ;;  %s623_s14 = sshll.u32 %s782_s13, 4  ;;  %s624_s14 = int_to_ptr.vmem [resolvable:$true] %s623_s14 }
   0x6   :  { %689 = vmatprep.subr.mxu0 %v47_v4  ;;  %v21_v9 = vrot.slane %v20_v7, 4  ;;  %696 = vmatprep.subr.mxu1 %v171_v35  ;;  %v170_v37 = vld [vmem:[%s920_s1 + $0x50] sm:$0xff]  ;;  %v169_v39 = vld [vmem:[%s920_s1 + $0x48] sm:$0xff]  ;;  %v164_v40 = vld [vmem:[%s920_s1 + $0x20] sm:$0xff]  ;;  %s760_s15 = scalar_lea.vmem %s624_s14, 256  ;;  %p765_p1 = scmp.lt.s32.totalorder %s624_s14, %s624_s14 }
   0x7   :  { %690 = vmatpush3.msra.mxu0 %v47_v4  ;;  %697 = vmatpush3.msra.mxu1 %v171_v35  ;;  %v168_v41 = vld [vmem:[%s920_s1 + $0x40] sm:$0xff]  ;;  %v370_v42 = vld [vmem:[%s920_s1 + $0x98] sm:$0xff]  ;;  %v365_v44 = vld [vmem:[%s920_s1 + $0x70] sm:$0xff]  ;;  %p761_p0 = scmp.ne.s32.totalorder %s624_s14, %s760_s15  ;;  %p766_p2 = scmp.lt.s32.totalorder %s760_s15, %s760_s15 }
   0x8   :  { %691 = vmatprep.subr.mxu0 %v46_v8  ;;  %v22_v10 = vadd.f32 %v21_v9, %v20_v7  ;;  %698 = vmatprep.subr.mxu1 %v170_v37  ;;  %v366_v43 = vld [vmem:[%s920_s1 + $0x78] sm:$0xff]  ;;  %v364_v45 = vld [vmem:[%s920_s1 + $0x68] sm:$0xff]  ;;  %v363_v46 = vld [vmem:[%s920_s1 + $0x60] sm:$0xff] }
   0x9   :  { %692 = vmatpush3.msra.mxu0 %v46_v8  ;;  %699 = vmatpush3.msra.mxu1 %v170_v37  ;;  %v634_v47 = vld [vmem:[%s921_s2] ss:$0 sm:$0xff]  ;;  %p767_p3 = por %p766_p2, %p765_p1 }
   0xa   :  { %v23_v11 = vrot.slane %v22_v10, 2  ;;  %707 = vmatprep.subr.mxu0 %v167_v34  ;;  %700 = vmatprep.subr.mxu1 %v169_v39 }
   0xb   :  { %701 = vmatpush3.msra.mxu1 %v169_v39  ;;  %p768_p4 = pnand %p767_p3, %p761_p0 }
   0xc   :  { %v24_v12 = vadd.f32 %v23_v11, %v22_v10  ;;  %702 = vmatprep.subr.mxu1 %v168_v41 }
   0xd   :  { %703 = vmatpush3.msra.mxu1 %v168_v41 }
   0xe   :  { %v25_v13 = vrot.slane %v24_v12, 1  ;;  %718 = vmatprep.subr.mxu1 %v370_v42 }
  0x10   :  { %v26_v14 = vadd.f32 %v25_v13, %v24_v12 }
  0x12   :  { %v27_v15 = vmul.f32 0.0625, %v26_v14 }
  0x14   :  { %v28_v16 = vsub.f32 %v15_v2, %v27_v15  ;;  %v29_v17 = vsub.f32 %v16_v3, %v27_v15 }
  0x16   :  { %v30_v18 = vmul.f32 %v28_v16, %v28_v16  ;;  %v31_v19 = vmul.f32 %v29_v17, %v29_v17 }
  0x18   :  { %v32_v20 = vsel %vm17_vm0, %v30_v18, 0.0  ;;  %v33_v21 = vsel %vm17_vm0, %v31_v19, 0.0  ;;  %v367_v18 = vld [vmem:[%s920_s1 + $0x80] sm:$0xff]  ;;  %v524_v19 = vld [vmem:[%s920_s1 + $0xb8] sm:$0xff] }
  0x19   :  { %v34_v22 = vadd.f32 %v33_v21, %v32_v20  ;;  %v523_v20 = vld [vmem:[%s920_s1 + $0xb0] sm:$0xff]  ;;  %v522_v21 = vld [vmem:[%s920_s1 + $0xa8] sm:$0xff] }
  0x1b   :  { %v35_v23 = vrot.slane %v34_v22, 4 }
  0x1d   :  { %v36_v24 = vadd.f32 %v35_v23, %v34_v22  ;;  %v521_v22 = vld [vmem:[%s920_s1 + $0xa0] sm:$0xff] }
  0x1f   :  { %v37_v25 = vrot.slane %v36_v24, 2 }
  0x21   :  { %v38_v26 = vadd.f32 %v37_v25, %v36_v24  ;;  %v641_v25 = vld [vmem:[%s921_s2 + $0x1] ss:$0 sm:$0xff] }
  0x23   :  { %v39_v27 = vrot.slane %v38_v26, 1 }
  0x25   :  { %v40_v28 = vadd.f32 %v39_v27, %v38_v26 }
  0x27   :  { %v41_v29 = vmul.f32 0.0625, %v40_v28 }
  0x29   :  { %v42_v30 = vadd.f32 1e-05, %v41_v29 }
  0x2b   :  { %754 = vrsqrt.f32 %v42_v30 }
  0x38   :  { %v755_v31 = vpop.eup %754 }
  0x39   :  { %v44_v32 = vmul.f32 %v755_v31, %v28_v16  ;;  %v45_v33 = vmul.f32 %v755_v31, %v29_v17  ;;  %v369_v16 = vld [vmem:[%s920_s1 + $0x90] sm:$0xff]  ;;  %v368_v17 = vld [vmem:[%s920_s1 + $0x88] sm:$0xff] }
  0x3b   :  { %693 = vmatprep.mubr.msk.f32.mxu0 %vm17_vm0, %v44_v32 }
  0x3c   :  { %694 = vmatmul.mubr.msk.f32.vlgmr.msra.gmra.mxu0 %vm17_vm0, %v45_v33 }
  0x3d   :  { %715 = vmatprep.mubr.msk.f32.mxu0 %vm17_vm0, %v44_v32  ;;  %708 = vmatpush3.msra.mxu0 %v167_v34 }
  0x3e   :  { %709 = vmatprep.subr.mxu0 %v166_v36 }
  0x3f   :  { %710 = vmatpush3.msra.mxu0 %v166_v36 }
  0x40   :  { %711 = vmatprep.subr.mxu0 %v165_v38 }
  0x41   :  { %712 = vmatpush3.msra.mxu0 %v165_v38 }
  0x42   :  { %713 = vmatprep.subr.mxu0 %v164_v40 }
  0x43   :  { %714 = vmatpush3.msra.mxu0 %v164_v40 }
  0x44   :  { %716 = vmatmul.mubr.msk.f32.vlgmr.msra.gmra.mxu0 %vm17_vm0, %v45_v33  ;;  %729 = vmatprep.subr.mxu0 %v366_v43 }
  0x45   :  { %737 = vmatprep.mubr.msk.f32.mxu0 %vm17_vm0, %v44_v32  ;;  %730 = vmatpush3.msra.mxu0 %v366_v43 }
  0x46   :  { %731 = vmatprep.subr.mxu0 %v365_v44 }
  0x47   :  { %732 = vmatpush3.msra.mxu0 %v365_v44 }
  0x48   :  { %733 = vmatprep.subr.mxu0 %v364_v45 }
  0x49   :  { %734 = vmatpush3.msra.mxu0 %v364_v45 }
  0x4a   :  { %735 = vmatprep.subr.mxu0 %v363_v46 }
  0x4b   :  { %736 = vmatpush3.msra.mxu0 %v363_v46 }
  0x4c   :  { %738 = vmatmul.mubr.msk.f32.vlgmr.msra.gmra.mxu0 %vm17_vm0, %v45_v33 }
  0xfc   :  { %v695_v48 = vpop.f32.mrf.mxu0 }
  0xfd   :  { %v133_v49 = vadd.f32 %v695_v48, %v634_v47 }
  0xfe   :  { %v127_v50 = vpop.f32.mrf.mxu0 }
  0xff   :  { %v128_v51 = vadd.f32 %v634_v47, %v127_v50  ;;  %v137_v52 = vsel %vm17_vm0, %v133_v49, 0.0 }
 0x101   :  { %v136_v53 = vsel %vm17_vm0, %v128_v51, 0.0 }
 0x102   :  { %v138_v54 = vadd.f32 %v137_v52, %v136_v53 }
 0x104   :  { %v139_v55 = vrot.slane %v138_v54, 4  ;;  %v717_v23 = vpop.f32.mrf.mxu0 }
 0x106   :  { %v140_v56 = vadd.f32 %v139_v55, %v138_v54  ;;  %v319_v27 = vpop.f32.mrf.mxu0 }
 0x108   :  { %v141_v57 = vrot.slane %v140_v56, 2 }
 0x10a   :  { %v142_v58 = vadd.f32 %v141_v57, %v140_v56 }
 0x10c   :  { %v143_v59 = vrot.slane %v142_v58, 1 }
 0x10e   :  { %v144_v60 = vadd.f32 %v143_v59, %v142_v58 }
 0x110   :  { %v145_v61 = vmul.f32 0.0625, %v144_v60 }
 0x112   :  { %v146_v62 = vsub.f32 %v128_v51, %v145_v61  ;;  %v147_v63 = vsub.f32 %v133_v49, %v145_v61  ;;  %v739_v61 = vpop.f32.mrf.mxu0 }
 0x114   :  { %v148_v0 = vmul.f32 %v146_v62, %v146_v62  ;;  %v149_v1 = vmul.f32 %v147_v63, %v147_v63 }
 0x116   :  { %v150_v2 = vsel %vm17_vm0, %v148_v0, 0.0  ;;  %v151_v3 = vsel %vm17_vm0, %v149_v1, 0.0 }
 0x117   :  { %v152_v4 = vadd.f32 %v151_v3, %v150_v2  ;;  %v648_v2 = vld [vmem:[%s921_s2 + $0x2] ss:$0 sm:$0xff] }
 0x119   :  { %v153_v5 = vrot.slane %v152_v4, 4 }
 0x11b   :  { %v154_v6 = vadd.f32 %v153_v5, %v152_v4 }
 0x11d   :  { %v155_v7 = vrot.slane %v154_v6, 2 }
 0x11f   :  { %v156_v8 = vadd.f32 %v155_v7, %v154_v6 }
 0x121   :  { %v157_v9 = vrot.slane %v156_v8, 1 }
 0x123   :  { %v158_v10 = vadd.f32 %v157_v9, %v156_v8 }
 0x125   :  { %v159_v11 = vmul.f32 0.0625, %v158_v10 }
 0x127   :  { %v160_v12 = vadd.f32 1e-05, %v159_v11 }
 0x129   :  { %756 = vrsqrt.f32 %v160_v12 }
 0x136   :  { %v757_v13 = vpop.eup %756 }
 0x137   :  { %v162_v14 = vmul.f32 %v757_v13, %v146_v62  ;;  %v163_v15 = vmul.f32 %v757_v13, %v147_v63  ;;  %v512_v63 = vpop.f32.mrf.mxu0 }
 0x139   :  { %704 = vmatprep.mubr.msk.f32.mxu1 %vm17_vm0, %v162_v14 }
 0x13a   :  { %705 = vmatmul.mubr.msk.f32.vlgmr.msra.gmra.mxu1 %vm17_vm0, %v163_v15 }
 0x13b   :  { %719 = vmatpush3.msra.mxu1 %v370_v42  ;;  %726 = vmatprep.mubr.msk.f32.mxu1 %vm17_vm0, %v162_v14 }
 0x13c   :  { %720 = vmatprep.subr.mxu1 %v369_v16 }
 0x13d   :  { %721 = vmatpush3.msra.mxu1 %v369_v16 }
 0x13e   :  { %722 = vmatprep.subr.mxu1 %v368_v17 }
 0x13f   :  { %723 = vmatpush3.msra.mxu1 %v368_v17 }
 0x140   :  { %724 = vmatprep.subr.mxu1 %v367_v18 }
 0x141   :  { %725 = vmatpush3.msra.mxu1 %v367_v18 }
 0x142   :  { %727 = vmatmul.mubr.msk.f32.vlgmr.msra.gmra.mxu1 %vm17_vm0, %v163_v15  ;;  %740 = vmatprep.subr.mxu1 %v524_v19 }
 0x143   :  { %741 = vmatpush3.msra.mxu1 %v524_v19 }
 0x144   :  { %742 = vmatprep.subr.mxu1 %v523_v20 }
 0x145   :  { %743 = vmatpush3.msra.mxu1 %v523_v20 }
 0x146   :  { %744 = vmatprep.subr.mxu1 %v522_v21 }
 0x147   :  { %745 = vmatpush3.msra.mxu1 %v522_v21 }
 0x148   :  { %746 = vmatprep.subr.mxu1 %v521_v22 }
 0x149   :  { %747 = vmatpush3.msra.mxu1 %v521_v22 }
 0x1fa   :  { %v706_v24 = vpop.f32.mrf.mxu1 }
 0x1fb   :  { %v325_v26 = vadd.f32 %v717_v23, %v706_v24 }
 0x1fc   :  { %v244_v28 = vpop.f32.mrf.mxu1 }
 0x1fd   :  { %v334_v29 = vadd.f32 %v641_v25, %v325_v26  ;;  %v320_v30 = vadd.f32 %v319_v27, %v244_v28 }
 0x1ff   :  { %v333_v31 = vadd.f32 %v641_v25, %v320_v30  ;;  %v336_v32 = vsel %vm17_vm0, %v334_v29, 0.0 }
 0x201   :  { %v335_v33 = vsel %vm17_vm0, %v333_v31, 0.0 }
 0x202   :  { %v337_v34 = vadd.f32 %v336_v32, %v335_v33  ;;  %v728_v60 = vpop.f32.mrf.mxu1 }
 0x203   :  { %v518_v0 = vadd.f32 %v739_v61, %v728_v60 }
 0x204   :  { %v338_v35 = vrot.slane %v337_v34, 4  ;;  %v437_v62 = vpop.f32.mrf.mxu1 }
 0x205   :  { %v513_v3 = vadd.f32 %v512_v63, %v437_v62 }
 0x206   :  { %v339_v36 = vadd.f32 %v338_v35, %v337_v34 }
 0x208   :  { %v340_v37 = vrot.slane %v339_v36, 2 }
 0x20a   :  { %v341_v38 = vadd.f32 %v340_v37, %v339_v36 }
 0x20c   :  { %v342_v39 = vrot.slane %v341_v38, 1 }
 0x20e   :  { %v343_v40 = vadd.f32 %v342_v39, %v341_v38 }
 0x210   :  { %v344_v41 = vmul.f32 0.0625, %v343_v40 }
 0x212   :  { %v345_v42 = vsub.f32 %v333_v31, %v344_v41  ;;  %v346_v43 = vsub.f32 %v334_v29, %v344_v41 }
 0x214   :  { %v347_v44 = vmul.f32 %v345_v42, %v345_v42  ;;  %v348_v45 = vmul.f32 %v346_v43, %v346_v43 }
 0x216   :  { %v349_v46 = vsel %vm17_vm0, %v347_v44, 0.0  ;;  %v350_v47 = vsel %vm17_vm0, %v348_v45, 0.0 }
 0x217   :  { %v351_v48 = vadd.f32 %v350_v47, %v349_v46 }
 0x219   :  { %v352_v49 = vrot.slane %v351_v48, 4 }
 0x21b   :  { %v353_v50 = vadd.f32 %v352_v49, %v351_v48 }
 0x21d   :  { %v354_v51 = vrot.slane %v353_v50, 2 }
 0x21f   :  { %v355_v52 = vadd.f32 %v354_v51, %v353_v50 }
 0x221   :  { %v356_v53 = vrot.slane %v355_v52, 1 }
 0x223   :  { %v357_v54 = vadd.f32 %v356_v53, %v355_v52 }
 0x225   :  { %v358_v55 = vmul.f32 0.0625, %v357_v54 }
 0x227   :  { %v359_v56 = vadd.f32 1e-05, %v358_v55 }
 0x229   :  { %758 = vrsqrt.f32 %v359_v56 }
 0x236   :  { %v759_v57 = vpop.eup %758 }
 0x237   :  { %v361_v58 = vmul.f32 %v759_v57, %v345_v42  ;;  %v362_v59 = vmul.f32 %v759_v57, %v346_v43 }
 0x239   :  { %748 = vmatprep.mubr.msk.f32.mxu1 %vm17_vm0, %v361_v58 }
 0x23a   :  { %749 = vmatmul.mubr.msk.f32.vlgmr.msra.gmra.mxu1 %vm17_vm0, %v362_v59 }
 0x2fa   :  { %v750_v1 = vpop.f32.mrf.mxu1 }
 0x2fb   :  { %v607_v4 = vadd.f32 %v750_v1, %v518_v0 }
 0x2fc   :  { %v597_v5 = vpop.f32.mrf.mxu1 }
 0x2fd   :  { %v614_v6 = vadd.f32 %v648_v2, %v607_v4  ;;  %v606_v7 = vadd.f32 %v597_v5, %v513_v3 }
 0x2ff   :  { %617 = vst.msk [vmem:[#allocation2 + $0x8] sm:$0xff] %vm615_vm1, %v614_v6  ;;  %v613_v8 = vadd.f32 %v648_v2, %v606_v7 }
 0x301   :  { %616 = vst.msk [vmem:[#allocation2] sm:$0xff] %vm615_vm1, %v613_v8 }
 0x302   :  { %771 = shalt.err (!%p768_p4)
}
 0x303   :  { %s783_s2 = smov 128   ;;  %s784_s16 = smov 8  }
 0x304   :  { %629 = dma.vmem_to_hbm [thread:$0]  %s624_s14, 256, %s922_s3, [#allocation3], %s783_s2, %s783_s2, %s784_s16  }
 0x305   :  { %780 = dma.done.wait [#allocation3], 256  }
 0x306   :  { %781 = vsyncadd [#allocation3], 4294967040 }
 0x307   :  { %633 = vsyncpa [#allocation3], 1 }

</bundles_post_ra>
